<compile_context>
chip_gen: v5e
topology: v5e:2x2
jax: 0.10.0
libtpu: 0.0.40
codegen_flags: <defaults>
</compile_context>

<pallas_src>
import jax
import jax.numpy as jnp
from jax.experimental import pallas as pl
from jax.experimental.pallas import tpu as pltpu

# ----------------------------------------------------------------------------
# Architecture description (matches the torch module __init__):
# (in_features, out_features) for fc1..fc14.
LAYER_DIMS = [
    (12, 12), (12, 11), (11, 10), (10, 9), (9, 8), (8, 7), (7, 6),
    (6, 7), (7, 8), (8, 9), (9, 10), (10, 11), (11, 12), (12, 2),
]
N_LAYERS = len(LAYER_DIMS)
IN_FEATURES = LAYER_DIMS[0][0]   # 12
NUM_CLASSES = LAYER_DIMS[-1][1]  # 2 (softmax over dim=1 of the (B, 2) logits)
PAD = 128                        # padded feature width (lane dim) for the MXU
MAX_BATCH_TILE = 2048            # batch tile cap; sweep {1024, 2048}


def _round_up(n, m):
    return ((n + m - 1) // m) * m


def _cdiv(a, b):
    return -(-a // b)


def _choose_tile(B):
    """Pick the batch tile TB (multiple of 8).

    B <= 512: one tile (splitting a tiny batch is not worth the per-step tax).
    B  > 512: an even number (>= 2) of equal-ish tiles, each <= MAX_BATCH_TILE,
              so the two v7x TensorCores get balanced work under the
              "parallel" grid axis (harmless on single-TC v5e/v6e)."""
    BP8 = _round_up(max(B, 1), 8)
    if BP8 <= 512:
        return BP8
    n_pairs = _cdiv(BP8, 2 * MAX_BATCH_TILE)          # grid will be 2*n_pairs
    return min(MAX_BATCH_TILE, _round_up(_cdiv(BP8, 2 * n_pairs), 8))


# ----------------------------------------------------------------------------
# Kernel
def csnet_kernel(x_ref, w_ref, b_ref, o_ref, xpad_ref):
    """x_ref:  (TB, 12)        f32   batch tile of raw inputs
       w_ref:  (14, 128, 128)  bf16  resident padded weights (x @ W layout)
       b_ref:  (14, 128)       f32   resident padded biases
       o_ref:  (TB, 2)         f32   softmax probabilities
       xpad_ref: (TB, 128)     f32   scratch; only lanes < 12 are ever written."""
    TB = xpad_ref.shape[0]

    # Place the 12 real features into the first lanes of the 128-wide tile.
    xpad_ref[:, :IN_FEATURES] = x_ref[...]
    # Lanes >= 12 of the scratch are never written (uninitialized / stale from
    # previous tiles); mask them to an exact 0 at read time instead of
    # zero-filling the scratch every tile.  Exact zeros are required so the
    # padded lanes stay 0 through every layer (padded weight rows/cols and
    # padded bias lanes are all exactly 0).
    lane = jax.lax.broadcasted_iota(jnp.int32, (TB, PAD), 1)
    h = jnp.where(lane < IN_FEATURES, xpad_ref[...], 0.0).astype(jnp.bfloat16)

    def linear(h_bf16, i):
        # Native bf16 x bf16 single-pass MXU matmul, f32 accumulation.
        y = jnp.dot(h_bf16, w_ref[i], preferred_element_type=jnp.float32)
        return y + b_ref[pl.ds(i, 1), :]                 # (1, 128) f32 bias

    relu = lambda t: jnp.maximum(t, 0.0)
    bf = lambda t: t.astype(jnp.bfloat16)

    h = relu(linear(h, 0)); id1 = h        # fc1  (12)
    h = relu(linear(bf(h), 1)); id2 = h    # fc2  (11)
    h = relu(linear(bf(h), 2)); id3 = h    # fc3  (10)
    h = relu(linear(bf(h), 3)); id4 = h    # fc4  (9)
    h = relu(linear(bf(h), 4)); id5 = h    # fc5  (8)
    h = relu(linear(bf(h), 5)); id6 = h    # fc6  (7)
    h = relu(linear(bf(h), 6))             # fc7  (6)
    h = relu(linear(bf(h), 7) + id6)       # fc8  (7)  + skip
    h = relu(linear(bf(h), 8) + id5)       # fc9  (8)  + skip
    h = relu(linear(bf(h), 9) + id4)       # fc10 (9)  + skip
    h = relu(linear(bf(h), 10) + id3)      # fc11 (10) + skip
    h = relu(linear(bf(h), 11) + id2)      # fc12 (11) + skip
    h = relu(linear(bf(h), 12) + id1)      # fc13 (12) + skip
    logits = linear(bf(h), 13)             # fc14: (TB, 128), lanes >= 2 are 0

    # 2-class softmax == per-row sigmoid of the logit difference.
    # Padded lanes of `logits` are exactly 0, so the row sum equals l0+l1 and
    # (l0+l1) - 2*l_k is ("other" - "own") at lanes 0 and 1:
    #   lane0 -> 1/(1+exp(l1-l0)) = p0,  lane1 -> 1/(1+exp(l0-l1)) = p1.
    tot = jnp.sum(logits, axis=1, keepdims=True)
    p = pl.reciprocal(1.0 + jnp.exp(tot - 2.0 * logits), approx=False)
    o_ref[...] = p[:, :NUM_CLASSES].astype(o_ref.dtype)


# ----------------------------------------------------------------------------
# Wrapper
@jax.jit
def csnet14_12p_forward(x, w_bf16, b_f32):
    """x: (B, 12) f32 -> (B, 2) f32 softmax probabilities."""
    B = x.shape[0]
    TB = _choose_tile(B)
    BP = _round_up(B, TB)

    x_in = x.astype(jnp.float32)
    if BP != B:  # pad only when needed; zero rows are harmless & sliced off
        x_in = jnp.pad(x_in, ((0, BP - B), (0, 0)))

    out = pl.pallas_call(
        csnet_kernel,
        out_shape=jax.ShapeDtypeStruct((BP, NUM_CLASSES), jnp.float32),
        grid=(BP // TB,),
        in_specs=[
            pl.BlockSpec((TB, IN_FEATURES), lambda i: (i, 0)),       # x tile
            pl.BlockSpec((N_LAYERS, PAD, PAD), lambda i: (0, 0, 0)), # resident W
            pl.BlockSpec((N_LAYERS, PAD), lambda i: (0, 0)),         # resident b
        ],
        out_specs=pl.BlockSpec((TB, NUM_CLASSES), lambda i: (i, 0)),
        scratch_shapes=[pltpu.VMEM((TB, PAD), jnp.float32)],
        compiler_params=pltpu.CompilerParams(
            dimension_semantics=("parallel",),           # 2 TCs on v7x
            vmem_limit_bytes=40 * 1024 * 1024),          # ~12-15 MiB @ TB=2048
    )(x_in, w_bf16, b_f32)

    return out[:B]


# ----------------------------------------------------------------------------
# Deterministic synthetic parameters (mimics torch.nn.Linear's
# uniform(-1/sqrt(fan_in), 1/sqrt(fan_in)) init).  Stored as (in, out) so the
# kernel computes x @ W + b == x @ W_torch.T + b.  Weights are stored in bf16
# (the model's weights); biases stay f32.  Padded entries are exactly 0 --
# required by the zero-propagation / softmax-as-sigmoid invariants above.
def make_params(key):
    w = jnp.zeros((N_LAYERS, PAD, PAD), jnp.float32)
    b = jnp.zeros((N_LAYERS, PAD), jnp.float32)
    for i, (fin, fout) in enumerate(LAYER_DIMS):
        key, kw, kb = jax.random.split(key, 3)
        bound = 1.0 / float(fin) ** 0.5
        wi = jax.random.uniform(kw, (fin, fout), jnp.float32, -bound, bound)
        bi = jax.random.uniform(kb, (fout,), jnp.float32, -bound, bound)
        w = w.at[i, :fin, :fout].set(wi)
        b = b.at[i, :fout].set(bi)
    return w.astype(jnp.bfloat16), b


def _ref_body(x, lin):
    relu = jax.nn.relu
    h = relu(lin(x.astype(jnp.float32), 0)); id1 = h
    h = relu(lin(h, 1)); id2 = h
    h = relu(lin(h, 2)); id3 = h
    h = relu(lin(h, 3)); id4 = h
    h = relu(lin(h, 4)); id5 = h
    h = relu(lin(h, 5)); id6 = h
    h = relu(lin(h, 6))
    h = relu(lin(h, 7) + id6)
    h = relu(lin(h, 8) + id5)
    h = relu(lin(h, 9) + id4)
    h = relu(lin(h, 10) + id3)
    h = relu(lin(h, 11) + id2)
    h = relu(lin(h, 12) + id1)
    logits = lin(h, 13)
    return jax.nn.softmax(logits, axis=1)


# Pure-JAX reference that mirrors the kernel math exactly (bf16 x bf16 matmul,
# f32 accumulation, f32 bias/relu/residual/softmax).  Tight-tolerance check.
def reference_forward(x, w_bf16, b):
    def lin(h, i):
        fin, fout = LAYER_DIMS[i]
        y = jnp.dot(h.astype(jnp.bfloat16), w_bf16[i, :fin, :fout],
                    preferred_element_type=jnp.float32)
        return y + b[i, :fout]
    return _ref_body(x, lin)


# Full-f32-activation reference (bf16-stored weights upcast once).  Used only
# for a deliberately relaxed sanity check that the bf16 matmul path preserves
# the module's forward-pass semantics.
def reference_forward_f32(x, w_bf16, b):
    w = w_bf16.astype(jnp.float32)

    def lin(h, i):
        fin, fout = LAYER_DIMS[i]
        return h @ w[i, :fin, :fout] + b[i, :fout]
    return _ref_body(x, lin)


def _check(x, w_bf16, b_f32):
    out = jax.block_until_ready(csnet14_12p_forward(x, w_bf16, b_f32))
    ref = reference_forward(x, w_bf16, b_f32)
    ref32 = reference_forward_f32(x, w_bf16, b_f32)
    assert out.shape == (x.shape[0], NUM_CLASSES), out.shape
    assert jnp.allclose(out, ref, atol=1e-4, rtol=1e-4)      # mirrored math
    assert jnp.allclose(out, ref32, atol=5e-2)               # relaxed (bf16 matmul)
    assert jnp.allclose(jnp.sum(out, axis=1), 1.0, atol=1e-5)
    return out


if __name__ == "__main__":
    key = jax.random.PRNGKey(0)
    kx, kx2, kx3, kp = jax.random.split(key, 4)
    w_bf16, b_f32 = make_params(kp)

    # Small-shape check (matches the module spec: (batch, 12) input): 1 tile.
    x = jax.random.normal(kx, (2, IN_FEATURES), jnp.float32)
    _check(x, w_bf16, b_f32)

    # Mid batch: 2 even tiles (v7x 2-TC split path), row padding, resident W.
    x2 = jax.random.normal(kx2, (515, IN_FEATURES), jnp.float32)
    _check(x2, w_bf16, b_f32)

    # Large batch: multi-pair tiling path (4 tiles, TB > 512).
    x3 = jax.random.normal(kx3, (4101, IN_FEATURES), jnp.float32)
    _check(x3, w_bf16, b_f32)

    print("KERNEL_OK")
</pallas_src>

<mosaic_0001>
module attributes {stable_mosaic.version = 11 : i64} {
  func.func @csnet_kernel(%arg0: i32, %arg1: memref<8x12xf32, #tpu.memory_space<vmem>>, %arg2: memref<14x128x128xbf16, #tpu.memory_space<vmem>>, %arg3: memref<14x128xf32, #tpu.memory_space<vmem>>, %arg4: memref<8x2xf32, #tpu.memory_space<vmem>>, %arg5: memref<8x128xf32, #tpu.memory_space<vmem>>) attributes {dimension_semantics = [#tpu.dimension_semantics<parallel>], iteration_bounds = array<i64: 1>, scalar_prefetch = 0 : i64, scratch_operands = 1 : i64, tpu.core_type = #tpu.core_type<tc>, window_params = [{transform_indices = @transform_0, window_bounds = array<i64: 8, 12>}, {pipeline_mode = #tpu.pipeline_mode<synchronous>, transform_indices = @transform_1, window_bounds = array<i64: 14, 128, 128>}, {pipeline_mode = #tpu.pipeline_mode<synchronous>, transform_indices = @transform_2, window_bounds = array<i64: 14, 128>}, {transform_indices = @transform_3, window_bounds = array<i64: 8, 2>}]} {
    %c0 = arith.constant 0 : index
    %c0_0 = arith.constant 0 : index
    %0 = vector.load %arg1[%c0, %c0_0] : memref<8x12xf32, #tpu.memory_space<vmem>>, vector<8x12xf32>
    %c0_1 = arith.constant 0 : index
    %c0_2 = arith.constant 0 : index
    %1 = vector.load %arg5[%c0_1, %c0_2] : memref<8x128xf32, #tpu.memory_space<vmem>>, vector<8x12xf32>
    tpu.vector_store %arg5[%c0_1, %c0_2], %0 {strides = array<i32>} : memref<8x128xf32, #tpu.memory_space<vmem>>, vector<8x12xf32>,
    %2 = tpu.iota {dimensions = array<i32: 1>} : vector<8x128xi32>
    %c12_i32 = arith.constant 12 : i32
    %3 = vector.broadcast %c12_i32 : i32 to vector<8x128xi32>
    %4 = arith.cmpi slt, %2, %3 : vector<8x128xi32>
    %c0_3 = arith.constant 0 : index
    %c0_4 = arith.constant 0 : index
    %5 = vector.load %arg5[%c0_3, %c0_4] : memref<8x128xf32, #tpu.memory_space<vmem>>, vector<8x128xf32>
    %cst = arith.constant 0.000000e+00 : f32
    %6 = vector.broadcast %cst : f32 to vector<8x128xf32>
    %7 = arith.select %4, %5, %6 : vector<8x128xi1>, vector<8x128xf32>
    %8 = arith.truncf %7 : vector<8x128xf32> to vector<8x128xbf16>
    %c0_5 = arith.constant 0 : index
    %c0_6 = arith.constant 0 : index
    %c0_7 = arith.constant 0 : index
    %9 = vector.load %arg2[%c0_5, %c0_6, %c0_7] : memref<14x128x128xbf16, #tpu.memory_space<vmem>>, vector<1x128x128xbf16>
    %10 = vector.shape_cast %9 : vector<1x128x128xbf16> to vector<128x128xbf16>
    %cst_8 = arith.constant dense<0.000000e+00> : vector<8x128xf32>
    %11 = tpu.matmul %8, %10, %cst_8 {dimension_numbers = #tpu.dot_dimension_numbers<[1], [0], [0], [1], [0, 0, 1, 1], [], []>} : vector<8x128xbf16>, vector<128x128xbf16>, vector<8x128xf32> -> vector<8x128xf32>
    %c0_9 = arith.constant 0 : index
    %c0_10 = arith.constant 0 : index
    %12 = vector.load %arg3[%c0_9, %c0_10] : memref<14x128xf32, #tpu.memory_space<vmem>>, vector<1x128xf32>
    %13 = vector.broadcast %12 : vector<1x128xf32> to vector<8x128xf32>
    %14 = arith.addf %11, %13 : vector<8x128xf32>
    %cst_11 = arith.constant 0.000000e+00 : f32
    %15 = vector.broadcast %cst_11 : f32 to vector<8x128xf32>
    %16 = arith.maximumf %14, %15 : vector<8x128xf32>
    %17 = arith.truncf %16 : vector<8x128xf32> to vector<8x128xbf16>
    %c1 = arith.constant 1 : index
    %c0_12 = arith.constant 0 : index
    %c0_13 = arith.constant 0 : index
    %18 = vector.load %arg2[%c1, %c0_12, %c0_13] : memref<14x128x128xbf16, #tpu.memory_space<vmem>>, vector<1x128x128xbf16>
    %19 = vector.shape_cast %18 : vector<1x128x128xbf16> to vector<128x128xbf16>
    %cst_14 = arith.constant dense<0.000000e+00> : vector<8x128xf32>
    %20 = tpu.matmul %17, %19, %cst_14 {dimension_numbers = #tpu.dot_dimension_numbers<[1], [0], [0], [1], [0, 0, 1, 1], [], []>} : vector<8x128xbf16>, vector<128x128xbf16>, vector<8x128xf32> -> vector<8x128xf32>
    %c1_15 = arith.constant 1 : index
    %c0_16 = arith.constant 0 : index
    %21 = vector.load %arg3[%c1_15, %c0_16] : memref<14x128xf32, #tpu.memory_space<vmem>>, vector<1x128xf32>
    %22 = vector.broadcast %21 : vector<1x128xf32> to vector<8x128xf32>
    %23 = arith.addf %20, %22 : vector<8x128xf32>
    %cst_17 = arith.constant 0.000000e+00 : f32
    %24 = vector.broadcast %cst_17 : f32 to vector<8x128xf32>
    %25 = arith.maximumf %23, %24 : vector<8x128xf32>
    %26 = arith.truncf %25 : vector<8x128xf32> to vector<8x128xbf16>
    %c2 = arith.constant 2 : index
    %c0_18 = arith.constant 0 : index
    %c0_19 = arith.constant 0 : index
    %27 = vector.load %arg2[%c2, %c0_18, %c0_19] : memref<14x128x128xbf16, #tpu.memory_space<vmem>>, vector<1x128x128xbf16>
    %28 = vector.shape_cast %27 : vector<1x128x128xbf16> to vector<128x128xbf16>
    %cst_20 = arith.constant dense<0.000000e+00> : vector<8x128xf32>
    %29 = tpu.matmul %26, %28, %cst_20 {dimension_numbers = #tpu.dot_dimension_numbers<[1], [0], [0], [1], [0, 0, 1, 1], [], []>} : vector<8x128xbf16>, vector<128x128xbf16>, vector<8x128xf32> -> vector<8x128xf32>
    %c2_21 = arith.constant 2 : index
    %c0_22 = arith.constant 0 : index
    %30 = vector.load %arg3[%c2_21, %c0_22] : memref<14x128xf32, #tpu.memory_space<vmem>>, vector<1x128xf32>
    %31 = vector.broadcast %30 : vector<1x128xf32> to vector<8x128xf32>
    %32 = arith.addf %29, %31 : vector<8x128xf32>
    %cst_23 = arith.constant 0.000000e+00 : f32
    %33 = vector.broadcast %cst_23 : f32 to vector<8x128xf32>
    %34 = arith.maximumf %32, %33 : vector<8x128xf32>
    %35 = arith.truncf %34 : vector<8x128xf32> to vector<8x128xbf16>
    %c3 = arith.constant 3 : index
    %c0_24 = arith.constant 0 : index
    %c0_25 = arith.constant 0 : index
    %36 = vector.load %arg2[%c3, %c0_24, %c0_25] : memref<14x128x128xbf16, #tpu.memory_space<vmem>>, vector<1x128x128xbf16>
    %37 = vector.shape_cast %36 : vector<1x128x128xbf16> to vector<128x128xbf16>
    %cst_26 = arith.constant dense<0.000000e+00> : vector<8x128xf32>
    %38 = tpu.matmul %35, %37, %cst_26 {dimension_numbers = #tpu.dot_dimension_numbers<[1], [0], [0], [1], [0, 0, 1, 1], [], []>} : vector<8x128xbf16>, vector<128x128xbf16>, vector<8x128xf32> -> vector<8x128xf32>
    %c3_27 = arith.constant 3 : index
    %c0_28 = arith.constant 0 : index
    %39 = vector.load %arg3[%c3_27, %c0_28] : memref<14x128xf32, #tpu.memory_space<vmem>>, vector<1x128xf32>
    %40 = vector.broadcast %39 : vector<1x128xf32> to vector<8x128xf32>
    %41 = arith.addf %38, %40 : vector<8x128xf32>
    %cst_29 = arith.constant 0.000000e+00 : f32
    %42 = vector.broadcast %cst_29 : f32 to vector<8x128xf32>
    %43 = arith.maximumf %41, %42 : vector<8x128xf32>
    %44 = arith.truncf %43 : vector<8x128xf32> to vector<8x128xbf16>
    %c4 = arith.constant 4 : index
    %c0_30 = arith.constant 0 : index
    %c0_31 = arith.constant 0 : index
    %45 = vector.load %arg2[%c4, %c0_30, %c0_31] : memref<14x128x128xbf16, #tpu.memory_space<vmem>>, vector<1x128x128xbf16>
    %46 = vector.shape_cast %45 : vector<1x128x128xbf16> to vector<128x128xbf16>
    %cst_32 = arith.constant dense<0.000000e+00> : vector<8x128xf32>
    %47 = tpu.matmul %44, %46, %cst_32 {dimension_numbers = #tpu.dot_dimension_numbers<[1], [0], [0], [1], [0, 0, 1, 1], [], []>} : vector<8x128xbf16>, vector<128x128xbf16>, vector<8x128xf32> -> vector<8x128xf32>
    %c4_33 = arith.constant 4 : index
    %c0_34 = arith.constant 0 : index
    %48 = vector.load %arg3[%c4_33, %c0_34] : memref<14x128xf32, #tpu.memory_space<vmem>>, vector<1x128xf32>
    %49 = vector.broadcast %48 : vector<1x128xf32> to vector<8x128xf32>
    %50 = arith.addf %47, %49 : vector<8x128xf32>
    %cst_35 = arith.constant 0.000000e+00 : f32
    %51 = vector.broadcast %cst_35 : f32 to vector<8x128xf32>
    %52 = arith.maximumf %50, %51 : vector<8x128xf32>
    %53 = arith.truncf %52 : vector<8x128xf32> to vector<8x128xbf16>
    %c5 = arith.constant 5 : index
    %c0_36 = arith.constant 0 : index
    %c0_37 = arith.constant 0 : index
    %54 = vector.load %arg2[%c5, %c0_36, %c0_37] : memref<14x128x128xbf16, #tpu.memory_space<vmem>>, vector<1x128x128xbf16>
    %55 = vector.shape_cast %54 : vector<1x128x128xbf16> to vector<128x128xbf16>
    %cst_38 = arith.constant dense<0.000000e+00> : vector<8x128xf32>
    %56 = tpu.matmul %53, %55, %cst_38 {dimension_numbers = #tpu.dot_dimension_numbers<[1], [0], [0], [1], [0, 0, 1, 1], [], []>} : vector<8x128xbf16>, vector<128x128xbf16>, vector<8x128xf32> -> vector<8x128xf32>
    %c5_39 = arith.constant 5 : index
    %c0_40 = arith.constant 0 : index
    %57 = vector.load %arg3[%c5_39, %c0_40] : memref<14x128xf32, #tpu.memory_space<vmem>>, vector<1x128xf32>
    %58 = vector.broadcast %57 : vector<1x128xf32> to vector<8x128xf32>
    %59 = arith.addf %56, %58 : vector<8x128xf32>
    %cst_41 = arith.constant 0.000000e+00 : f32
    %60 = vector.broadcast %cst_41 : f32 to vector<8x128xf32>
    %61 = arith.maximumf %59, %60 : vector<8x128xf32>
    %62 = arith.truncf %61 : vector<8x128xf32> to vector<8x128xbf16>
    %c6 = arith.constant 6 : index
    %c0_42 = arith.constant 0 : index
    %c0_43 = arith.constant 0 : index
    %63 = vector.load %arg2[%c6, %c0_42, %c0_43] : memref<14x128x128xbf16, #tpu.memory_space<vmem>>, vector<1x128x128xbf16>
    %64 = vector.shape_cast %63 : vector<1x128x128xbf16> to vector<128x128xbf16>
    %cst_44 = arith.constant dense<0.000000e+00> : vector<8x128xf32>
    %65 = tpu.matmul %62, %64, %cst_44 {dimension_numbers = #tpu.dot_dimension_numbers<[1], [0], [0], [1], [0, 0, 1, 1], [], []>} : vector<8x128xbf16>, vector<128x128xbf16>, vector<8x128xf32> -> vector<8x128xf32>
    %c6_45 = arith.constant 6 : index
    %c0_46 = arith.constant 0 : index
    %66 = vector.load %arg3[%c6_45, %c0_46] : memref<14x128xf32, #tpu.memory_space<vmem>>, vector<1x128xf32>
    %67 = vector.broadcast %66 : vector<1x128xf32> to vector<8x128xf32>
    %68 = arith.addf %65, %67 : vector<8x128xf32>
    %cst_47 = arith.constant 0.000000e+00 : f32
    %69 = vector.broadcast %cst_47 : f32 to vector<8x128xf32>
    %70 = arith.maximumf %68, %69 : vector<8x128xf32>
    %71 = arith.truncf %70 : vector<8x128xf32> to vector<8x128xbf16>
    %c7 = arith.constant 7 : index
    %c0_48 = arith.constant 0 : index
    %c0_49 = arith.constant 0 : index
    %72 = vector.load %arg2[%c7, %c0_48, %c0_49] : memref<14x128x128xbf16, #tpu.memory_space<vmem>>, vector<1x128x128xbf16>
    %73 = vector.shape_cast %72 : vector<1x128x128xbf16> to vector<128x128xbf16>
    %cst_50 = arith.constant dense<0.000000e+00> : vector<8x128xf32>
    %74 = tpu.matmul %71, %73, %cst_50 {dimension_numbers = #tpu.dot_dimension_numbers<[1], [0], [0], [1], [0, 0, 1, 1], [], []>} : vector<8x128xbf16>, vector<128x128xbf16>, vector<8x128xf32> -> vector<8x128xf32>
    %c7_51 = arith.constant 7 : index
    %c0_52 = arith.constant 0 : index
    %75 = vector.load %arg3[%c7_51, %c0_52] : memref<14x128xf32, #tpu.memory_space<vmem>>, vector<1x128xf32>
    %76 = vector.broadcast %75 : vector<1x128xf32> to vector<8x128xf32>
    %77 = arith.addf %74, %76 : vector<8x128xf32>
    %78 = arith.addf %77, %61 : vector<8x128xf32>
    %cst_53 = arith.constant 0.000000e+00 : f32
    %79 = vector.broadcast %cst_53 : f32 to vector<8x128xf32>
    %80 = arith.maximumf %78, %79 : vector<8x128xf32>
    %81 = arith.truncf %80 : vector<8x128xf32> to vector<8x128xbf16>
    %c8 = arith.constant 8 : index
    %c0_54 = arith.constant 0 : index
    %c0_55 = arith.constant 0 : index
    %82 = vector.load %arg2[%c8, %c0_54, %c0_55] : memref<14x128x128xbf16, #tpu.memory_space<vmem>>, vector<1x128x128xbf16>
    %83 = vector.shape_cast %82 : vector<1x128x128xbf16> to vector<128x128xbf16>
    %cst_56 = arith.constant dense<0.000000e+00> : vector<8x128xf32>
    %84 = tpu.matmul %81, %83, %cst_56 {dimension_numbers = #tpu.dot_dimension_numbers<[1], [0], [0], [1], [0, 0, 1, 1], [], []>} : vector<8x128xbf16>, vector<128x128xbf16>, vector<8x128xf32> -> vector<8x128xf32>
    %c8_57 = arith.constant 8 : index
    %c0_58 = arith.constant 0 : index
    %85 = vector.load %arg3[%c8_57, %c0_58] : memref<14x128xf32, #tpu.memory_space<vmem>>, vector<1x128xf32>
    %86 = vector.broadcast %85 : vector<1x128xf32> to vector<8x128xf32>
    %87 = arith.addf %84, %86 : vector<8x128xf32>
    %88 = arith.addf %87, %52 : vector<8x128xf32>
    %cst_59 = arith.constant 0.000000e+00 : f32
    %89 = vector.broadcast %cst_59 : f32 to vector<8x128xf32>
    %90 = arith.maximumf %88, %89 : vector<8x128xf32>
    %91 = arith.truncf %90 : vector<8x128xf32> to vector<8x128xbf16>
    %c9 = arith.constant 9 : index
    %c0_60 = arith.constant 0 : index
    %c0_61 = arith.constant 0 : index
    %92 = vector.load %arg2[%c9, %c0_60, %c0_61] : memref<14x128x128xbf16, #tpu.memory_space<vmem>>, vector<1x128x128xbf16>
    %93 = vector.shape_cast %92 : vector<1x128x128xbf16> to vector<128x128xbf16>
    %cst_62 = arith.constant dense<0.000000e+00> : vector<8x128xf32>
    %94 = tpu.matmul %91, %93, %cst_62 {dimension_numbers = #tpu.dot_dimension_numbers<[1], [0], [0], [1], [0, 0, 1, 1], [], []>} : vector<8x128xbf16>, vector<128x128xbf16>, vector<8x128xf32> -> vector<8x128xf32>
    %c9_63 = arith.constant 9 : index
    %c0_64 = arith.constant 0 : index
    %95 = vector.load %arg3[%c9_63, %c0_64] : memref<14x128xf32, #tpu.memory_space<vmem>>, vector<1x128xf32>
    %96 = vector.broadcast %95 : vector<1x128xf32> to vector<8x128xf32>
    %97 = arith.addf %94, %96 : vector<8x128xf32>
    %98 = arith.addf %97, %43 : vector<8x128xf32>
    %cst_65 = arith.constant 0.000000e+00 : f32
    %99 = vector.broadcast %cst_65 : f32 to vector<8x128xf32>
    %100 = arith.maximumf %98, %99 : vector<8x128xf32>
    %101 = arith.truncf %100 : vector<8x128xf32> to vector<8x128xbf16>
    %c10 = arith.constant 10 : index
    %c0_66 = arith.constant 0 : index
    %c0_67 = arith.constant 0 : index
    %102 = vector.load %arg2[%c10, %c0_66, %c0_67] : memref<14x128x128xbf16, #tpu.memory_space<vmem>>, vector<1x128x128xbf16>
    %103 = vector.shape_cast %102 : vector<1x128x128xbf16> to vector<128x128xbf16>
    %cst_68 = arith.constant dense<0.000000e+00> : vector<8x128xf32>
    %104 = tpu.matmul %101, %103, %cst_68 {dimension_numbers = #tpu.dot_dimension_numbers<[1], [0], [0], [1], [0, 0, 1, 1], [], []>} : vector<8x128xbf16>, vector<128x128xbf16>, vector<8x128xf32> -> vector<8x128xf32>
    %c10_69 = arith.constant 10 : index
    %c0_70 = arith.constant 0 : index
    %105 = vector.load %arg3[%c10_69, %c0_70] : memref<14x128xf32, #tpu.memory_space<vmem>>, vector<1x128xf32>
    %106 = vector.broadcast %105 : vector<1x128xf32> to vector<8x128xf32>
    %107 = arith.addf %104, %106 : vector<8x128xf32>
    %108 = arith.addf %107, %34 : vector<8x128xf32>
    %cst_71 = arith.constant 0.000000e+00 : f32
    %109 = vector.broadcast %cst_71 : f32 to vector<8x128xf32>
    %110 = arith.maximumf %108, %109 : vector<8x128xf32>
    %111 = arith.truncf %110 : vector<8x128xf32> to vector<8x128xbf16>
    %c11 = arith.constant 11 : index
    %c0_72 = arith.constant 0 : index
    %c0_73 = arith.constant 0 : index
    %112 = vector.load %arg2[%c11, %c0_72, %c0_73] : memref<14x128x128xbf16, #tpu.memory_space<vmem>>, vector<1x128x128xbf16>
    %113 = vector.shape_cast %112 : vector<1x128x128xbf16> to vector<128x128xbf16>
    %cst_74 = arith.constant dense<0.000000e+00> : vector<8x128xf32>
    %114 = tpu.matmul %111, %113, %cst_74 {dimension_numbers = #tpu.dot_dimension_numbers<[1], [0], [0], [1], [0, 0, 1, 1], [], []>} : vector<8x128xbf16>, vector<128x128xbf16>, vector<8x128xf32> -> vector<8x128xf32>
    %c11_75 = arith.constant 11 : index
    %c0_76 = arith.constant 0 : index
    %115 = vector.load %arg3[%c11_75, %c0_76] : memref<14x128xf32, #tpu.memory_space<vmem>>, vector<1x128xf32>
    %116 = vector.broadcast %115 : vector<1x128xf32> to vector<8x128xf32>
    %117 = arith.addf %114, %116 : vector<8x128xf32>
    %118 = arith.addf %117, %25 : vector<8x128xf32>
    %cst_77 = arith.constant 0.000000e+00 : f32
    %119 = vector.broadcast %cst_77 : f32 to vector<8x128xf32>
    %120 = arith.maximumf %118, %119 : vector<8x128xf32>
    %121 = arith.truncf %120 : vector<8x128xf32> to vector<8x128xbf16>
    %c12 = arith.constant 12 : index
    %c0_78 = arith.constant 0 : index
    %c0_79 = arith.constant 0 : index
    %122 = vector.load %arg2[%c12, %c0_78, %c0_79] : memref<14x128x128xbf16, #tpu.memory_space<vmem>>, vector<1x128x128xbf16>
    %123 = vector.shape_cast %122 : vector<1x128x128xbf16> to vector<128x128xbf16>
    %cst_80 = arith.constant dense<0.000000e+00> : vector<8x128xf32>
    %124 = tpu.matmul %121, %123, %cst_80 {dimension_numbers = #tpu.dot_dimension_numbers<[1], [0], [0], [1], [0, 0, 1, 1], [], []>} : vector<8x128xbf16>, vector<128x128xbf16>, vector<8x128xf32> -> vector<8x128xf32>
    %c12_81 = arith.constant 12 : index
    %c0_82 = arith.constant 0 : index
    %125 = vector.load %arg3[%c12_81, %c0_82] : memref<14x128xf32, #tpu.memory_space<vmem>>, vector<1x128xf32>
    %126 = vector.broadcast %125 : vector<1x128xf32> to vector<8x128xf32>
    %127 = arith.addf %124, %126 : vector<8x128xf32>
    %128 = arith.addf %127, %16 : vector<8x128xf32>
    %cst_83 = arith.constant 0.000000e+00 : f32
    %129 = vector.broadcast %cst_83 : f32 to vector<8x128xf32>
    %130 = arith.maximumf %128, %129 : vector<8x128xf32>
    %131 = arith.truncf %130 : vector<8x128xf32> to vector<8x128xbf16>
    %c13 = arith.constant 13 : index
    %c0_84 = arith.constant 0 : index
    %c0_85 = arith.constant 0 : index
    %132 = vector.load %arg2[%c13, %c0_84, %c0_85] : memref<14x128x128xbf16, #tpu.memory_space<vmem>>, vector<1x128x128xbf16>
    %133 = vector.shape_cast %132 : vector<1x128x128xbf16> to vector<128x128xbf16>
    %cst_86 = arith.constant dense<0.000000e+00> : vector<8x128xf32>
    %134 = tpu.matmul %131, %133, %cst_86 {dimension_numbers = #tpu.dot_dimension_numbers<[1], [0], [0], [1], [0, 0, 1, 1], [], []>} : vector<8x128xbf16>, vector<128x128xbf16>, vector<8x128xf32> -> vector<8x128xf32>
    %c13_87 = arith.constant 13 : index
    %c0_88 = arith.constant 0 : index
    %135 = vector.load %arg3[%c13_87, %c0_88] : memref<14x128xf32, #tpu.memory_space<vmem>>, vector<1x128xf32>
    %136 = vector.broadcast %135 : vector<1x128xf32> to vector<8x128xf32>
    %137 = arith.addf %134, %136 : vector<8x128xf32>
    %cst_89 = arith.constant dense<0.000000e+00> : vector<8xf32>
    %138 = vector.multi_reduction <add>, %137, %cst_89 [1] : vector<8x128xf32> to vector<8xf32>
    %139 = vector.shape_cast %138 : vector<8xf32> to vector<8x1xf32>
    %cst_90 = arith.constant 2.000000e+00 : f32
    %140 = vector.broadcast %cst_90 : f32 to vector<8x128xf32>
    %141 = arith.mulf %140, %137 : vector<8x128xf32>
    %142 = vector.broadcast %139 : vector<8x1xf32> to vector<8x128xf32>
    %143 = arith.subf %142, %141 : vector<8x128xf32>
    %144 = math.exp %143 : vector<8x128xf32>
    %cst_91 = arith.constant 1.000000e+00 : f32
    %145 = vector.broadcast %cst_91 : f32 to vector<8x128xf32>
    %146 = arith.addf %145, %144 : vector<8x128xf32>
    %147 = tpu.reciprocal %146 : vector<8x128xf32> -> vector<8x128xf32>
    %148 = vector.extract_strided_slice %147 {offsets = [0, 0], sizes = [8, 2], strides = [1, 1]} : vector<8x128xf32> to vector<8x2xf32>
    %c0_92 = arith.constant 0 : index
    %c0_93 = arith.constant 0 : index
    %149 = vector.load %arg4[%c0_92, %c0_93] : memref<8x2xf32, #tpu.memory_space<vmem>>, vector<8x2xf32>
    tpu.vector_store %arg4[%c0_92, %c0_93], %148 {strides = array<i32>} : memref<8x2xf32, #tpu.memory_space<vmem>>, vector<8x2xf32>,
    return
  }
  func.func @transform_0(%arg0: i32) -> (i32, i32) {
    %c0_i32 = arith.constant 0 : i32
    %c0_i32_0 = arith.constant 0 : i32
    return %arg0, %c0_i32 : i32, i32
  }
  func.func @transform_1(%arg0: i32) -> (i32, i32, i32) {
    %c0_i32 = arith.constant 0 : i32
    %c0_i32_0 = arith.constant 0 : i32
    %c0_i32_1 = arith.constant 0 : i32
    %c0_i32_2 = arith.constant 0 : i32
    return %c0_i32, %c0_i32_0, %c0_i32_1 : i32, i32, i32
  }
  func.func @transform_2(%arg0: i32) -> (i32, i32) {
    %c0_i32 = arith.constant 0 : i32
    %c0_i32_0 = arith.constant 0 : i32
    %c0_i32_1 = arith.constant 0 : i32
    return %c0_i32, %c0_i32_0 : i32, i32
  }
  func.func @transform_3(%arg0: i32) -> (i32, i32) {
    %c0_i32 = arith.constant 0 : i32
    %c0_i32_0 = arith.constant 0 : i32
    return %arg0, %c0_i32 : i32, i32
  }
}

</mosaic_0001>

<bundles_post_ra>
// kernel: csnet14_12p_forward.1
= control target key start
LH: loop header
LB: loop body
LE: loop exit
PB: predicated region body
PF: predicated region fallthrough
CT: control target
= control target key end

     0   :  { %8 = vsyncpa [#allocation4], 0  ;;  %s1937_s0 = inlined_call_operand.vmem [shape: f32[8,12], index: 0, kind: input, shape index: {}]   ;;  %s1938_s1 = inlined_call_operand.hbm [shape: bf16[14,128,128], index: 1, kind: input, shape index: {}]   ;;  %s1939_s2 = inlined_call_operand.hbm [shape: f32[14,128], index: 2, kind: input, shape index: {}]   ;;  %s1940_s3 = inlined_call_operand.vmem [shape: f32[8,2], index: 3, kind: output, shape index: {}]  }
   0x1   :  { %s16_s14 = sshll.u32 %s1938_s1, 4  ;;  %s17_s14 = int_to_ptr.hbm [resolvable:$true] %s16_s14 }
   0x2   :  { %9 = vsyncpa [#allocation6], 0  ;;  %s1874_s15 = smov [#allocation3]   ;;  %s29_s19 = sshll.u32 %s1939_s2, 4  ;;  %s30_s19 = int_to_ptr.hbm [resolvable:$true] %s29_s19 }
   0x3   :  { %s18_s16 = sshll.u32 %s1874_s15, 4  ;;  %s1875_s20 = smov 64   ;;  %s19_s16 = int_to_ptr.vmem [resolvable:$true] %s18_s16 }
   0x4   :  { %s1876_s21 = smov 4   ;;  %s1877_s22 = smov [#allocation5]  }
   0x5   :  { %24 = dma.hbm_to_vmem [thread:$0]  %s17_s14, 14336, %s19_s16, [#allocation4], %s1875_s20, %s1875_s20, %s1876_s21  }
   0x6   :  { %s31_s23 = sshll.u32 %s1877_s22, 4  ;;  %s1878_s24 = smov 128   ;;  %s32_s23 = int_to_ptr.vmem [resolvable:$true] %s31_s23 }
   0x7   :  { %s1879_s25 = smov 8  }
   0x8   :  { %37 = dma.hbm_to_vmem [thread:$0]  %s30_s19, 256, %s32_s23, [#allocation6], %s1878_s24, %s1878_s24, %s1879_s25  }
   0x9   :  { %1870 = dma.done.wait [#allocation4], 14336  }
   0xa   :  { %1871 = vsyncadd [#allocation4], 4294952960 }
   0xb   :  { %1872 = dma.done.wait [#allocation6], 256  }
   0xc   :  { %1873 = vsyncadd [#allocation6], 4294967040  ;;  %v1693_v0 = vld [vmem:[#allocation3 + $0x38] sm:$0xff]  ;;  %vm47_vm0 = vcmask 97280   ;;  %v1692_v1 = vld [vmem:[#allocation3 + $0x30] sm:$0xff]  ;;  %v49_v12 = vlaneseq  ;;  %vm1227_vm6 = vcmask 15360  }
   0xd   :  { %121 = vmatpush.bf16.msra.mxu0 %v1693_v0  ;;  %v46_v2 = vld [vmem:[%s1937_s0] sm:$0xff]  ;;  %v1691_v4 = vld [vmem:[#allocation3 + $0x28] sm:$0xff]  ;;  %v1700_v5 = vld [vmem:[#allocation3 + $0x70] sm:$0xff] }
   0xe   :  { %48 = vst.msk [vmem:[#allocation2] sm:$0xff] %vm47_vm0, %v46_v2  ;;  %v1701_v3 = vld [vmem:[#allocation3 + $0x78] sm:$0xff]  ;;  %v1699_v6 = vld [vmem:[#allocation3 + $0x68] sm:$0xff]  ;;  %v1690_v7 = vld [vmem:[#allocation3 + $0x20] sm:$0xff]  ;;  %v50_v15 = vand.u32 127, %v49_v12 }
   0xf   :  { %203 = vmatpush.bf16.msra.mxu1 %v1701_v3  ;;  %v1698_v8 = vld [vmem:[#allocation3 + $0x60] sm:$0xff]  ;;  %v1689_v9 = vld [vmem:[#allocation3 + $0x18] sm:$0xff]  ;;  %v1688_v11 = vld [vmem:[#allocation3 + $0x10] sm:$0xff] }
  0x10   :  { %v1697_v10 = vld [vmem:[#allocation3 + $0x58] sm:$0xff]  ;;  %v1696_v13 = vld [vmem:[#allocation3 + $0x50] sm:$0xff]  ;;  %v1687_v14 = vld [vmem:[#allocation3 + $0x8] sm:$0xff]  ;;  %vm51_vm1 = vcmp.lt.s32.totalorder %v50_v15, 12 }
  0x11   :  { %122 = vmatpush.bf16.msra.mxu0 %v1692_v1  ;;  %v1686_v16 = vld [vmem:[#allocation3] sm:$0xff]  ;;  %vm1267_vm2 = vmpackc.low %vm51_vm1, %vm51_vm1  ;;  %v1695_v19 = vld [vmem:[#allocation3 + $0x48] sm:$0xff] }
  0x12   :  { %v1694_v20 = vld [vmem:[#allocation3 + $0x40] sm:$0xff]  ;;  %v1709_v21 = vld [vmem:[#allocation3 + $0xb8] sm:$0xff]  ;;  %v1708_v22 = vld [vmem:[#allocation3 + $0xb0] sm:$0xff] }
  0x13   :  { %204 = vmatpush.bf16.msra.mxu1 %v1700_v5  ;;  %285 = vmatpush.bf16.msra.mxu2 %v1709_v21  ;;  %v1707_v23 = vld [vmem:[#allocation3 + $0xa8] sm:$0xff]  ;;  %v1706_v24 = vld [vmem:[#allocation3 + $0xa0] sm:$0xff]  ;;  %v1705_v25 = vld [vmem:[#allocation3 + $0x98] sm:$0xff] }
  0x14   :  { %v1704_v26 = vld [vmem:[#allocation3 + $0x90] sm:$0xff]  ;;  %v1804_v27 = vld [vmem:[#allocation5] ss:$0 sm:$0xff]  ;;  %v1703_v33 = vld [vmem:[#allocation3 + $0x88] sm:$0xff] }
  0x15   :  { %123 = vmatpush.bf16.msra.mxu0 %v1691_v4  ;;  %v52_v17 = vld [vmem:[#allocation2] sm:$0xff]  ;;  %v1702_v34 = vld [vmem:[#allocation3 + $0x80] sm:$0xff]  ;;  %v1716_v36 = vld [vmem:[#allocation3 + $0xf0] sm:$0xff] }
  0x16   :  { %v1268_v18 = vpack.c.bf16 %v52_v17, %v52_v17  ;;  %v1717_v35 = vld [vmem:[#allocation3 + $0xf8] sm:$0xff]  ;;  %v1715_v37 = vld [vmem:[#allocation3 + $0xe8] sm:$0xff]  ;;  %v1714_v38 = vld [vmem:[#allocation3 + $0xe0] sm:$0xff] }
  0x17   :  { %205 = vmatpush.bf16.msra.mxu1 %v1699_v6  ;;  %286 = vmatpush.bf16.msra.mxu2 %v1708_v22  ;;  %v1713_v39 = vld [vmem:[#allocation3 + $0xd8] sm:$0xff]  ;;  %v1712_v40 = vld [vmem:[#allocation3 + $0xd0] sm:$0xff]  ;;  %v1805_v41 = vld [vmem:[#allocation5 + $0x1] ss:$0 sm:$0xff] }
  0x18   :  { %367 = vmatpush.bf16.msra.mxu3 %v1717_v35  ;;  %v1711_v47 = vld [vmem:[#allocation3 + $0xc8] sm:$0xff]  ;;  %v1710_v48 = vld [vmem:[#allocation3 + $0xc0] sm:$0xff]  ;;  %v1725_v49 = vld [vmem:[#allocation3 + $0x138] sm:$0xff] }
  0x19   :  { %124 = vmatpush.bf16.msra.mxu0 %v1690_v7  ;;  %v1724_v50 = vld [vmem:[#allocation3 + $0x130] sm:$0xff]  ;;  %v1723_v51 = vld [vmem:[#allocation3 + $0x128] sm:$0xff]  ;;  %v1722_v52 = vld [vmem:[#allocation3 + $0x120] sm:$0xff] }
  0x1a   :  { %v1721_v53 = vld [vmem:[#allocation3 + $0x118] sm:$0xff]  ;;  %v1720_v54 = vld [vmem:[#allocation3 + $0x110] sm:$0xff]  ;;  %v1806_v55 = vld [vmem:[#allocation5 + $0x2] ss:$0 sm:$0xff] }
  0x1b   :  { %206 = vmatpush.bf16.msra.mxu1 %v1698_v8  ;;  %287 = vmatpush.bf16.msra.mxu2 %v1707_v23  ;;  %v1719_v61 = vld [vmem:[#allocation3 + $0x108] sm:$0xff]  ;;  %v1718_v62 = vld [vmem:[#allocation3 + $0x100] sm:$0xff]  ;;  %v1733_v63 = vld [vmem:[#allocation3 + $0x178] sm:$0xff] }
  0x1c   :  { %368 = vmatpush.bf16.msra.mxu3 %v1716_v36  ;;  %v1732_v0 = vld [vmem:[#allocation3 + $0x170] sm:$0xff]  ;;  %v1731_v1 = vld [vmem:[#allocation3 + $0x168] sm:$0xff]  ;;  %v1730_v2 = vld [vmem:[#allocation3 + $0x160] sm:$0xff] }
  0x1d   :  { %125 = vmatpush.bf16.msra.mxu0 %v1689_v9  ;;  %v1729_v3 = vld [vmem:[#allocation3 + $0x158] sm:$0xff]  ;;  %v1728_v4 = vld [vmem:[#allocation3 + $0x150] sm:$0xff]  ;;  %v1807_v5 = vld [vmem:[#allocation5 + $0x3] ss:$0 sm:$0xff] }
  0x1e   :  { %v1726_v12 = vld [vmem:[#allocation3 + $0x140] sm:$0xff]  ;;  %v1739_v15 = vld [vmem:[#allocation3 + $0x1a8] sm:$0xff]  ;;  %v1737_v17 = vld [vmem:[#allocation3 + $0x198] sm:$0xff] }
  0x1f   :  { %207 = vmatpush.bf16.msra.mxu1 %v1697_v10  ;;  %288 = vmatpush.bf16.msra.mxu2 %v1706_v24 }
  0x20   :  { %369 = vmatpush.bf16.msra.mxu3 %v1715_v37 }
  0x21   :  { %126 = vmatpush.bf16.msra.mxu0 %v1688_v11  ;;  %v1727_v11 = vld [vmem:[#allocation3 + $0x148] sm:$0xff] }
  0x23   :  { %208 = vmatpush.bf16.msra.mxu1 %v1696_v13  ;;  %289 = vmatpush.bf16.msra.mxu2 %v1705_v25  ;;  %v1741_v13 = vld [vmem:[#allocation3 + $0x1b8] sm:$0xff]  ;;  %v1735_v25 = vld [vmem:[#allocation3 + $0x188] sm:$0xff] }
  0x24   :  { %370 = vmatpush.bf16.msra.mxu3 %v1714_v38 }
  0x25   :  { %127 = vmatpush.bf16.msra.mxu0 %v1687_v14  ;;  %v1740_v14 = vld [vmem:[#allocation3 + $0x1b0] sm:$0xff] }
  0x27   :  { %209 = vmatpush.bf16.msra.mxu1 %v1695_v19  ;;  %290 = vmatpush.bf16.msra.mxu2 %v1704_v26  ;;  %v1808_v19 = vld [vmem:[#allocation5 + $0x4] ss:$0 sm:$0xff] }
  0x28   :  { %371 = vmatpush.bf16.msra.mxu3 %v1713_v39  ;;  %v1734_v26 = vld [vmem:[#allocation3 + $0x180] sm:$0xff] }
  0x29   :  { %128 = vmatpush.bf16.msra.mxu0 %v1686_v16  ;;  %v1738_v16 = vld [vmem:[#allocation3 + $0x1a0] sm:$0xff] }
  0x2b   :  { %210 = vmatpush.bf16.msra.mxu1 %v1694_v20  ;;  %291 = vmatpush.bf16.msra.mxu2 %v1703_v33  ;;  %v1744_v33 = vld [vmem:[#allocation3 + $0x1d0] sm:$0xff] }
  0x2c   :  { %1269 = vmatmul.msk.bf16.vlgmr.msra.gmra.mxu0 %vm1267_vm2, %v1268_v18  ;;  %372 = vmatpush.bf16.msra.mxu3 %v1712_v40  ;;  %v1736_v18 = vld [vmem:[#allocation3 + $0x190] sm:$0xff]  ;;  %v1743_v40 = vld [vmem:[#allocation3 + $0x1c8] sm:$0xff] }
  0x2d   :  { %449 = vmatpush.bf16.msrb.mxu0 %v1725_v49  ;;  %v1810_v49 = vld [vmem:[#allocation5 + $0x6] ss:$0 sm:$0xff] }
  0x2f   :  { %292 = vmatpush.bf16.msra.mxu2 %v1702_v34  ;;  %531 = vmatpush.bf16.msrb.mxu1 %v1733_v63  ;;  %v1809_v34 = vld [vmem:[#allocation5 + $0x5] ss:$0 sm:$0xff]  ;;  %v1760_v63 = vld [vmem:[#allocation3 + $0x250] sm:$0xff] }
  0x30   :  { %373 = vmatpush.bf16.msra.mxu3 %v1711_v47  ;;  %v1753_v47 = vld [vmem:[#allocation3 + $0x218] sm:$0xff] }
  0x31   :  { %450 = vmatpush.bf16.msrb.mxu0 %v1724_v50 }
  0x33   :  { %532 = vmatpush.bf16.msrb.mxu1 %v1732_v0  ;;  %613 = vmatpush.bf16.msrb.mxu2 %v1741_v13  ;;  %v1811_v0 = vld [vmem:[#allocation5 + $0x7] ss:$0 sm:$0xff] }
  0x34   :  { %374 = vmatpush.bf16.msra.mxu3 %v1710_v48  ;;  %v1752_v48 = vld [vmem:[#allocation3 + $0x210] sm:$0xff]  ;;  %v1770_v13 = vld [vmem:[#allocation3 + $0x2a0] sm:$0xff] }
  0x35   :  { %451 = vmatpush.bf16.msrb.mxu0 %v1723_v51 }
  0x37   :  { %533 = vmatpush.bf16.msrb.mxu1 %v1731_v1  ;;  %614 = vmatpush.bf16.msrb.mxu2 %v1740_v14  ;;  %v1769_v14 = vld [vmem:[#allocation3 + $0x298] sm:$0xff] }
  0x39   :  { %452 = vmatpush.bf16.msrb.mxu0 %v1722_v52 }
  0x3b   :  { %534 = vmatpush.bf16.msrb.mxu1 %v1730_v2  ;;  %615 = vmatpush.bf16.msrb.mxu2 %v1739_v15  ;;  %v1768_v15 = vld [vmem:[#allocation3 + $0x290] sm:$0xff] }
  0x3d   :  { %453 = vmatpush.bf16.msrb.mxu0 %v1721_v53 }
  0x3f   :  { %535 = vmatpush.bf16.msrb.mxu1 %v1729_v3  ;;  %616 = vmatpush.bf16.msrb.mxu2 %v1738_v16  ;;  %v1812_v16 = vld [vmem:[#allocation5 + $0x8] ss:$0 sm:$0xff] }
  0x41   :  { %454 = vmatpush.bf16.msrb.mxu0 %v1720_v54 }
  0x43   :  { %536 = vmatpush.bf16.msrb.mxu1 %v1728_v4  ;;  %617 = vmatpush.bf16.msrb.mxu2 %v1737_v17 }
  0x45   :  { %455 = vmatpush.bf16.msrb.mxu0 %v1719_v61  ;;  %v1762_v61 = vld [vmem:[#allocation3 + $0x260] sm:$0xff] }
  0x47   :  { %537 = vmatpush.bf16.msrb.mxu1 %v1727_v11  ;;  %618 = vmatpush.bf16.msrb.mxu2 %v1736_v18  ;;  %v1772_v11 = vld [vmem:[#allocation3 + $0x2b0] sm:$0xff] }
  0x49   :  { %456 = vmatpush.bf16.msrb.mxu0 %v1718_v62  ;;  %v1761_v62 = vld [vmem:[#allocation3 + $0x258] sm:$0xff] }
  0x4b   :  { %538 = vmatpush.bf16.msrb.mxu1 %v1726_v12  ;;  %619 = vmatpush.bf16.msrb.mxu2 %v1735_v25  ;;  %v1771_v12 = vld [vmem:[#allocation3 + $0x2a8] sm:$0xff]  ;;  %v1766_v25 = vld [vmem:[#allocation3 + $0x280] sm:$0xff] }
  0x4f   :  { %620 = vmatpush.bf16.msrb.mxu2 %v1734_v26  ;;  %v1781_v26 = vld [vmem:[#allocation3 + $0x2f8] sm:$0xff] }
  0xa9   :  { %v130_v28 = vpop.f32.mrf.mxu0 }
  0xaa   :  { %v131_v29 = vadd.f32 %v1804_v27, %v130_v28  ;;  %v1749_v27 = vld [vmem:[#allocation3 + $0x1f8] sm:$0xff]  ;;  %v1748_v28 = vld [vmem:[#allocation3 + $0x1f0] sm:$0xff] }
  0xab   :  { %695 = vmatpush.bf16.msrb.mxu3 %v1749_v27  ;;  %v1780_v27 = vld [vmem:[#allocation3 + $0x2f0] sm:$0xff] }
  0xac   :  { %v1909_v30 = vmax.f32 %v131_v29, 0.0  ;;  %v1747_v29 = vld [vmem:[#allocation3 + $0x1e8] sm:$0xff] }
  0xae   :  { %v135_v31 = vpack.c.bf16 %v1909_v30, %v1909_v30 }
  0xaf   :  { %696 = vmatpush.bf16.msrb.mxu3 %v1748_v28  ;;  %v1779_v28 = vld [vmem:[#allocation3 + $0x2e8] sm:$0xff] }
  0xb0   :  { %211 = vmatmul.bf16.vlgmr.msra.gmra.mxu1 %v135_v31  ;;  %v1746_v31 = vld [vmem:[#allocation3 + $0x1e0] sm:$0xff] }
  0xb1   :  { %v132_v32 = vpop.f32.mrf.mxu0 }
  0xb2   :  { %v1745_v32 = vld [vmem:[#allocation3 + $0x1d8] sm:$0xff] }
  0xb3   :  { %697 = vmatpush.bf16.msrb.mxu3 %v1747_v29  ;;  %v1778_v29 = vld [vmem:[#allocation3 + $0x2e0] sm:$0xff] }
  0xb7   :  { %698 = vmatpush.bf16.msrb.mxu3 %v1746_v31  ;;  %v1777_v31 = vld [vmem:[#allocation3 + $0x2d8] sm:$0xff] }
  0xbb   :  { %699 = vmatpush.bf16.msrb.mxu3 %v1745_v32  ;;  %v1776_v32 = vld [vmem:[#allocation3 + $0x2d0] sm:$0xff] }
  0xbf   :  { %700 = vmatpush.bf16.msrb.mxu3 %v1744_v33 }
  0xc3   :  { %701 = vmatpush.bf16.msrb.mxu3 %v1743_v40  ;;  %v1774_v40 = vld [vmem:[#allocation3 + $0x2c0] sm:$0xff] }
 0x12d   :  { %v212_v42 = vpop.f32.mrf.mxu1 }
 0x12e   :  { %v213_v43 = vadd.f32 %v1805_v41, %v212_v42  ;;  %v1742_v41 = vld [vmem:[#allocation3 + $0x1c0] sm:$0xff]  ;;  %v1757_v42 = vld [vmem:[#allocation3 + $0x238] sm:$0xff] }
 0x12f   :  { %702 = vmatpush.bf16.msrb.mxu3 %v1742_v41  ;;  %778 = vmatpush.bf16.msra.mxu0 %v1757_v42  ;;  %v1789_v41 = vld [vmem:[#allocation3 + $0x338] sm:$0xff]  ;;  %v1788_v42 = vld [vmem:[#allocation3 + $0x330] sm:$0xff] }
 0x130   :  { %v1913_v44 = vmax.f32 %v213_v43, 0.0  ;;  %v1756_v43 = vld [vmem:[#allocation3 + $0x230] sm:$0xff] }
 0x132   :  { %v217_v45 = vpack.c.bf16 %v1913_v44, %v1913_v44 }
 0x133   :  { %779 = vmatpush.bf16.msra.mxu0 %v1756_v43  ;;  %v1787_v43 = vld [vmem:[#allocation3 + $0x328] sm:$0xff] }
 0x134   :  { %293 = vmatmul.bf16.vlgmr.msra.gmra.mxu2 %v217_v45  ;;  %v1755_v45 = vld [vmem:[#allocation3 + $0x228] sm:$0xff] }
 0x135   :  { %v214_v46 = vpop.f32.mrf.mxu1 }
 0x136   :  { %v1754_v46 = vld [vmem:[#allocation3 + $0x220] sm:$0xff] }
 0x137   :  { %780 = vmatpush.bf16.msra.mxu0 %v1755_v45  ;;  %v1786_v45 = vld [vmem:[#allocation3 + $0x320] sm:$0xff] }
 0x13b   :  { %781 = vmatpush.bf16.msra.mxu0 %v1754_v46  ;;  %v1785_v46 = vld [vmem:[#allocation3 + $0x318] sm:$0xff] }
 0x13f   :  { %782 = vmatpush.bf16.msra.mxu0 %v1753_v47  ;;  %v1784_v47 = vld [vmem:[#allocation3 + $0x310] sm:$0xff] }
 0x143   :  { %783 = vmatpush.bf16.msra.mxu0 %v1752_v48 }
 0x1b7   :  { %v294_v56 = vpop.f32.mrf.mxu2 }
 0x1b8   :  { %v295_v57 = vadd.f32 %v1806_v55, %v294_v56  ;;  %v1751_v55 = vld [vmem:[#allocation3 + $0x208] sm:$0xff]  ;;  %v1750_v56 = vld [vmem:[#allocation3 + $0x200] sm:$0xff] }
 0x1b9   :  { %784 = vmatpush.bf16.msra.mxu0 %v1751_v55  ;;  %v1782_v55 = vld [vmem:[#allocation3 + $0x300] sm:$0xff] }
 0x1ba   :  { %v1917_v58 = vmax.f32 %v295_v57, 0.0  ;;  %v1765_v57 = vld [vmem:[#allocation3 + $0x278] sm:$0xff] }
 0x1bb   :  { %861 = vmatpush.bf16.msra.mxu1 %v1765_v57  ;;  %v1796_v57 = vld [vmem:[#allocation3 + $0x370] sm:$0xff] }
 0x1bc   :  { %v299_v59 = vpack.c.bf16 %v1917_v58, %v1917_v58 }
 0x1bd   :  { %785 = vmatpush.bf16.msra.mxu0 %v1750_v56  ;;  %v1797_v56 = vld [vmem:[#allocation3 + $0x378] sm:$0xff] }
 0x1be   :  { %375 = vmatmul.bf16.vlgmr.msra.gmra.mxu3 %v299_v59  ;;  %v1764_v59 = vld [vmem:[#allocation3 + $0x270] sm:$0xff] }
 0x1bf   :  { %v296_v60 = vpop.f32.mrf.mxu2  ;;  %862 = vmatpush.bf16.msra.mxu1 %v1764_v59  ;;  %1027 = vmatpush.bf16.msra.mxu3 %v1781_v26  ;;  %v1795_v59 = vld [vmem:[#allocation3 + $0x368] sm:$0xff] }
 0x1c0   :  { %v1763_v60 = vld [vmem:[#allocation3 + $0x268] sm:$0xff] }
 0x1c3   :  { %863 = vmatpush.bf16.msra.mxu1 %v1763_v60  ;;  %1028 = vmatpush.bf16.msra.mxu3 %v1780_v27  ;;  %v1794_v60 = vld [vmem:[#allocation3 + $0x360] sm:$0xff] }
 0x1c7   :  { %864 = vmatpush.bf16.msra.mxu1 %v1762_v61  ;;  %1029 = vmatpush.bf16.msra.mxu3 %v1779_v28  ;;  %v1793_v61 = vld [vmem:[#allocation3 + $0x358] sm:$0xff] }
 0x1cb   :  { %865 = vmatpush.bf16.msra.mxu1 %v1761_v62  ;;  %1030 = vmatpush.bf16.msra.mxu3 %v1778_v29  ;;  %v1792_v62 = vld [vmem:[#allocation3 + $0x350] sm:$0xff] }
 0x1cf   :  { %866 = vmatpush.bf16.msra.mxu1 %v1760_v63  ;;  %1031 = vmatpush.bf16.msra.mxu3 %v1777_v31 }
 0x1d3   :  { %1032 = vmatpush.bf16.msra.mxu3 %v1776_v32 }
 0x241   :  { %v376_v6 = vpop.f32.mrf.mxu3 }
 0x242   :  { %v377_v7 = vadd.f32 %v1807_v5, %v376_v6 }
 0x244   :  { %v1921_v8 = vmax.f32 %v377_v7, 0.0  ;;  %v1759_v7 = vld [vmem:[#allocation3 + $0x248] sm:$0xff] }
 0x245   :  { %867 = vmatpush.bf16.msra.mxu1 %v1759_v7  ;;  %v1816_v7 = vld [vmem:[#allocation5 + $0xc] ss:$0 sm:$0xff] }
 0x246   :  { %v381_v9 = vpack.c.bf16 %v1921_v8, %v1921_v8 }
 0x248   :  { %457 = vmatmul.bf16.vlgmr.msrb.gmra.mxu0 %v381_v9  ;;  %v1758_v9 = vld [vmem:[#allocation3 + $0x240] sm:$0xff] }
 0x249   :  { %v378_v10 = vpop.f32.mrf.mxu3  ;;  %868 = vmatpush.bf16.msra.mxu1 %v1758_v9  ;;  %1110 = vmatpush.bf16.msrb.mxu0 %v1789_v41 }
 0x24a   :  { %v1773_v10 = vld [vmem:[#allocation3 + $0x2b8] sm:$0xff] }
 0x24b   :  { %944 = vmatpush.bf16.msra.mxu2 %v1773_v10 }
 0x24d   :  { %1111 = vmatpush.bf16.msrb.mxu0 %v1788_v42 }
 0x24f   :  { %945 = vmatpush.bf16.msra.mxu2 %v1772_v11 }
 0x251   :  { %1112 = vmatpush.bf16.msrb.mxu0 %v1787_v43 }
 0x253   :  { %946 = vmatpush.bf16.msra.mxu2 %v1771_v12 }
 0x255   :  { %1113 = vmatpush.bf16.msrb.mxu0 %v1786_v45 }
 0x257   :  { %947 = vmatpush.bf16.msra.mxu2 %v1770_v13 }
 0x259   :  { %1114 = vmatpush.bf16.msrb.mxu0 %v1785_v46 }
 0x25b   :  { %948 = vmatpush.bf16.msra.mxu2 %v1769_v14 }
 0x25d   :  { %1115 = vmatpush.bf16.msrb.mxu0 %v1784_v47 }
 0x25f   :  { %949 = vmatpush.bf16.msra.mxu2 %v1768_v15  ;;  %v1817_v15 = vld [vmem:[#allocation5 + $0xd] ss:$0 sm:$0xff] }
 0x2c5   :  { %v458_v20 = vpop.f32.mrf.mxu0 }
 0x2c6   :  { %v459_v21 = vadd.f32 %v1808_v19, %v458_v20 }
 0x2c8   :  { %v1925_v22 = vmax.f32 %v459_v21, 0.0 }
 0x2ca   :  { %v463_v23 = vpack.c.bf16 %v1925_v22, %v1925_v22 }
 0x2cc   :  { %539 = vmatmul.bf16.vlgmr.msrb.gmra.mxu1 %v463_v23 }
 0x2cd   :  { %v460_v24 = vpop.f32.mrf.mxu0  ;;  %1193 = vmatpush.bf16.msrb.mxu1 %v1797_v56 }
 0x2ce   :  { %v1767_v24 = vld [vmem:[#allocation3 + $0x288] sm:$0xff] }
 0x2cf   :  { %950 = vmatpush.bf16.msra.mxu2 %v1767_v24 }
 0x2d1   :  { %1194 = vmatpush.bf16.msrb.mxu1 %v1796_v57 }
 0x2d3   :  { %951 = vmatpush.bf16.msra.mxu2 %v1766_v25 }
 0x2d5   :  { %1195 = vmatpush.bf16.msrb.mxu1 %v1795_v59 }
 0x2d9   :  { %1196 = vmatpush.bf16.msrb.mxu1 %v1794_v60 }
 0x2dd   :  { %1197 = vmatpush.bf16.msrb.mxu1 %v1793_v61 }
 0x2e1   :  { %1198 = vmatpush.bf16.msrb.mxu1 %v1792_v62 }
 0x349   :  { %v540_v35 = vpop.f32.mrf.mxu1 }
 0x34a   :  { %v541_v36 = vadd.f32 %v1809_v34, %v540_v35 }
 0x34c   :  { %v544_v37 = vmax.f32 %v541_v36, 0.0 }
 0x34e   :  { %v545_v38 = vpack.c.bf16 %v544_v37, %v544_v37 }
 0x350   :  { %621 = vmatmul.bf16.vlgmr.msrb.gmra.mxu2 %v545_v38 }
 0x351   :  { %v542_v39 = vpop.f32.mrf.mxu1 }
 0x352   :  { %v1775_v39 = vld [vmem:[#allocation3 + $0x2c8] sm:$0xff] }
 0x353   :  { %1033 = vmatpush.bf16.msra.mxu3 %v1775_v39 }
 0x357   :  { %1034 = vmatpush.bf16.msra.mxu3 %v1774_v40 }
 0x3d3   :  { %v622_v50 = vpop.f32.mrf.mxu2 }
 0x3d4   :  { %v623_v51 = vadd.f32 %v1810_v49, %v622_v50 }
 0x3d6   :  { %v626_v52 = vmax.f32 %v623_v51, 0.0 }
 0x3d8   :  { %v627_v53 = vpack.c.bf16 %v626_v52, %v626_v52 }
 0x3da   :  { %703 = vmatmul.bf16.vlgmr.msrb.gmra.mxu3 %v627_v53 }
 0x3db   :  { %v624_v54 = vpop.f32.mrf.mxu2 }
 0x3dc   :  { %v1783_v54 = vld [vmem:[#allocation3 + $0x308] sm:$0xff] }
 0x3dd   :  { %1116 = vmatpush.bf16.msrb.mxu0 %v1783_v54 }
 0x3e1   :  { %1117 = vmatpush.bf16.msrb.mxu0 %v1782_v55 }
 0x45d   :  { %v704_v1 = vpop.f32.mrf.mxu3 }
 0x45e   :  { %v705_v2 = vadd.f32 %v1811_v0, %v704_v1 }
 0x460   :  { %v708_v3 = vadd.f32 %v705_v2, %v544_v37 }
 0x462   :  { %v709_v4 = vmax.f32 %v708_v3, 0.0 }
 0x464   :  { %v710_v5 = vpack.c.bf16 %v709_v4, %v709_v4 }
 0x465   :  { %v706_v6 = vpop.f32.mrf.mxu3 }
 0x466   :  { %786 = vmatmul.bf16.vlgmr.msra.gmra.mxu0 %v710_v5  ;;  %v1791_v5 = vld [vmem:[#allocation3 + $0x348] sm:$0xff]  ;;  %v1790_v6 = vld [vmem:[#allocation3 + $0x340] sm:$0xff] }
 0x467   :  { %1199 = vmatpush.bf16.msrb.mxu1 %v1791_v5 }
 0x46b   :  { %1200 = vmatpush.bf16.msrb.mxu1 %v1790_v6 }
 0x4e3   :  { %v787_v17 = vpop.f32.mrf.mxu0 }
 0x4e4   :  { %v788_v18 = vadd.f32 %v1812_v16, %v787_v17 }
 0x4e6   :  { %v791_v19 = vadd.f32 %v788_v18, %v1925_v22  ;;  %v1813_v22 = vld [vmem:[#allocation5 + $0x9] ss:$0 sm:$0xff] }
 0x4e8   :  { %v792_v20 = vmax.f32 %v791_v19, 0.0 }
 0x4ea   :  { %v793_v21 = vpack.c.bf16 %v792_v20, %v792_v20 }
 0x4eb   :  { %v789_v23 = vpop.f32.mrf.mxu0 }
 0x4ec   :  { %869 = vmatmul.bf16.vlgmr.msra.gmra.mxu1 %v793_v21 }
 0x569   :  { %v870_v33 = vpop.f32.mrf.mxu1 }
 0x56a   :  { %v871_v34 = vadd.f32 %v1813_v22, %v870_v33 }
 0x56c   :  { %v874_v35 = vadd.f32 %v871_v34, %v1921_v8  ;;  %v1814_v8 = vld [vmem:[#allocation5 + $0xa] ss:$0 sm:$0xff] }
 0x56e   :  { %v875_v36 = vmax.f32 %v874_v35, 0.0 }
 0x570   :  { %v876_v37 = vpack.c.bf16 %v875_v36, %v875_v36 }
 0x571   :  { %v872_v38 = vpop.f32.mrf.mxu1 }
 0x572   :  { %952 = vmatmul.bf16.vlgmr.msra.gmra.mxu2 %v876_v37 }
 0x5f5   :  { %v953_v48 = vpop.f32.mrf.mxu2 }
 0x5f6   :  { %v954_v49 = vadd.f32 %v1814_v8, %v953_v48 }
 0x5f8   :  { %v957_v50 = vadd.f32 %v954_v49, %v1917_v58  ;;  %v1815_v58 = vld [vmem:[#allocation5 + $0xb] ss:$0 sm:$0xff] }
 0x5fa   :  { %v958_v51 = vmax.f32 %v957_v50, 0.0 }
 0x5fc   :  { %v959_v52 = vpack.c.bf16 %v958_v51, %v958_v51 }
 0x5fd   :  { %v955_v53 = vpop.f32.mrf.mxu2 }
 0x5fe   :  { %1035 = vmatmul.bf16.vlgmr.msra.gmra.mxu3 %v959_v52 }
 0x681   :  { %v1036_v63 = vpop.f32.mrf.mxu3 }
 0x682   :  { %v1037_v0 = vadd.f32 %v1815_v58, %v1036_v63 }
 0x684   :  { %v1040_v1 = vadd.f32 %v1037_v0, %v1913_v44 }
 0x686   :  { %v1041_v2 = vmax.f32 %v1040_v1, 0.0 }
 0x688   :  { %v1042_v3 = vpack.c.bf16 %v1041_v2, %v1041_v2 }
 0x689   :  { %v1038_v4 = vpop.f32.mrf.mxu3 }
 0x68a   :  { %1118 = vmatmul.bf16.vlgmr.msrb.gmra.mxu0 %v1042_v3 }
 0x707   :  { %v1119_v9 = vpop.f32.mrf.mxu0 }
 0x708   :  { %v1120_v10 = vadd.f32 %v1816_v7, %v1119_v9 }
 0x70a   :  { %v1123_v11 = vadd.f32 %v1120_v10, %v1909_v30 }
 0x70c   :  { %v1124_v12 = vmax.f32 %v1123_v11, 0.0 }
 0x70e   :  { %v1125_v13 = vpack.c.bf16 %v1124_v12, %v1124_v12 }
 0x70f   :  { %v1121_v14 = vpop.f32.mrf.mxu0 }
 0x710   :  { %1201 = vmatmul.bf16.vlgmr.msrb.gmra.mxu1 %v1125_v13 }
 0x78d   :  { %v1202_v16 = vpop.f32.mrf.mxu1 }
 0x78e   :  { %v1203_v44 = vadd.f32 %v1817_v15, %v1202_v16 }
 0x790   :  { %1206 = vadd.xlane.f32.xlu0 %v1203_v44  ;;  %v1208_v18 = vmul.f32 2.0, %v1203_v44 }
 0x795   :  { %v1204_v17 = vpop.f32.mrf.mxu1 }
 0x803   :  { %v1207_v19 = vpop.xlane.xlu0 %1206 }
 0x804   :  { %v1209_v20 = vsub.f32 %v1207_v19, %v1208_v18 }
 0x806   :  { %v1210_v21 = vmul.f32 1.442695, %v1209_v20 }
 0x808   :  { %1818 = vpow2.f32 %v1210_v21 }
 0x80e   :  { %v1819_v23 = vpop.eup %1818 }
 0x80f   :  { %v1212_v24 = vadd.f32 1.0, %v1819_v23 }
 0x811   :  { %1820 = vrcp.f32 %v1212_v24  ;;  %v1224_v27 = vand.u32 2147483648, %v1212_v24  ;;  %v1222_v29 = vand.u32 2147483647, %v1212_v24  ;;  %vm1218_vm4 = vweird.f32 %v1212_v24 }
 0x813   :  { %v1225_v32 = vor.u32 1.1754944e-38, %v1224_v27  ;;  %vm1223_vm7 = vcmp.eq.f32.partialorder %v1222_v29, 8.507059e+37 }
 0x817   :  { %v1821_v25 = vpop.eup %1820 }
 0x818   :  { %v1214_v26 = vmul.f32 %v1821_v25, %v1212_v24  ;;  %vm1219_vm3 = vweird.f32 %v1821_v25 }
 0x819   :  { %vm1220_vm5 = vmor %vm1218_vm4, %vm1219_vm3 }
 0x81a   :  { %v1215_v30 = vsub.f32 1.0, %v1214_v26 }
 0x81c   :  { %v1216_v28 = vmul.f32 %v1821_v25, %v1215_v30 }
 0x81e   :  { %v1217_v31 = vadd.f32 %v1821_v25, %v1216_v28 }
 0x820   :  { %v1221_v22 = vsel %vm1220_vm5, %v1821_v25, %v1217_v31 }
 0x821   :  { %v1226_v33 = vsel %vm1223_vm7, %v1225_v32, %v1221_v22 }
 0x822   :  { %1228 = vst.msk [vmem:[%s1940_s3] sm:$0xff] %vm1227_vm6, %v1226_v33 }
 0x823   :  { %1233 = vsyncpa [#allocation4], 1 }
 0x824   :  { %1234 = vsyncpa [#allocation6], 1 }

</bundles_post_ra>
